<compile_context>
chip_gen: v5e
topology: v5e:2x2
jax: 0.10.0
libtpu: 0.0.40
codegen_flags: <defaults>
</compile_context>

<pallas_src>
import jax
import jax.numpy as jnp
from jax.experimental import pallas as pl
from jax.experimental.pallas import tpu as pltpu

EPS = 1e-5     # torch.nn.BatchNorm1d default eps
LANE = 128     # TPU lane width; feature-tile width (lane-dense output)


def _fused_kernel(x_ref, w_ref, g_ref, beta_ref, noise_ref, o_ref):
    """Linear -> BatchNorm1d(training) -> + uniform noise, for one feature tile."""
    # ---- Linear on the MXU: bf16 inputs, f32 accumulation ----
    x = x_ref[...].astype(jnp.bfloat16)
    w = w_ref[...].astype(jnp.bfloat16)
    y = jnp.dot(x, w, preferred_element_type=jnp.float32)          # (B, TN) f32
    # Linear bias intentionally not added: BN's batch-mean subtraction cancels it exactly.

    # ---- BatchNorm1d (training mode, biased variance), folded into scale/shift ----
    mean = jnp.mean(y, axis=0, keepdims=True)                       # (1, TN)
    var = jnp.mean(y * y, axis=0, keepdims=True) - mean * mean      # E[y^2] - E[y]^2
    scale = g_ref[...] * jax.lax.rsqrt(var + EPS)                   # gamma / sqrt(var+eps)  (EUP)
    shift = beta_ref[...] - mean * scale                            # beta - mean*scale

    # ---- z = y*scale + shift, plus uniform[0,1) noise streamed per tile ----
    o_ref[...] = y * scale + shift + noise_ref[...]


def model_forward(x, w_t, gamma, beta, noise, *, tn=LANE):
    """x:(B,IN) f32, w_t:(IN,OUT) f32 (pre-transposed Linear weight),
    gamma/beta:(OUT,) f32, noise:(B,OUT) uniform[0,1).  Returns (B,OUT) f32."""
    B, IN = x.shape
    OUT = w_t.shape[1]

    # Lane-dense padding of the feature axis: pad OUT up to a multiple of 128 so every
    # vector store is a full unmasked vst; slice the real columns back off afterwards.
    out_pad = pl.cdiv(OUT, tn) * tn
    pad = out_pad - OUT
    w_p = jnp.pad(w_t, ((0, 0), (0, pad)))                              # zero cols -> y_pad = 0
    g_p = jnp.pad(gamma.reshape(1, OUT), ((0, 0), (0, pad)), constant_values=1.0)
    b_p = jnp.pad(beta.reshape(1, OUT), ((0, 0), (0, pad)))
    n_p = jnp.pad(noise, ((0, 0), (0, pad)))

    grid = (out_pad // tn,)  # independent feature tiles

    out_p = pl.pallas_call(
        _fused_kernel,
        out_shape=jax.ShapeDtypeStruct((B, out_pad), jnp.float32),
        grid=grid,
        in_specs=[
            pl.BlockSpec((B, IN), lambda j: (0, 0)),    # x: same block for every feature tile
            pl.BlockSpec((IN, tn), lambda j: (0, j)),   # W column tile
            pl.BlockSpec((1, tn), lambda j: (0, j)),    # gamma tile
            pl.BlockSpec((1, tn), lambda j: (0, j)),    # beta tile
            pl.BlockSpec((B, tn), lambda j: (0, j)),    # noise tile (per-tile stream, grid-safe)
        ],
        out_specs=pl.BlockSpec((B, tn), lambda j: (0, j)),
        compiler_params=pltpu.CompilerParams(
            dimension_semantics=("parallel",),          # shard feature tiles across cores (v7x)
        ),
    )(x, w_p, g_p, b_p, n_p)
    return out_p[:, :OUT]


if __name__ == "__main__":
    # batch > 1 so BatchNorm1d training-mode batch statistics are well defined
    B, IN, OUT = 8, 10, 5

    key = jax.random.PRNGKey(0)
    kx, kw, kn = jax.random.split(key, 3)

    # deterministic parameter init (mimics nn.Linear's U(-1/sqrt(in), 1/sqrt(in)))
    bound = 1.0 / (IN ** 0.5)
    w = jax.random.uniform(kw, (OUT, IN), jnp.float32, -bound, bound)   # PyTorch (out, in)
    gamma = jnp.ones((OUT,), jnp.float32)    # BatchNorm1d weight
    beta = jnp.zeros((OUT,), jnp.float32)    # BatchNorm1d bias
    # (Linear bias exists in the module but is exactly cancelled by BN's mean subtraction,
    #  so it is not passed to the kernel.)

    x = jax.random.normal(kx, (B, IN), jnp.float32)
    # torch.rand(v2.shape): uniform [0,1) noise, precomputed on host and streamed in per tile.
    noise = jax.random.uniform(kn, (B, OUT), jnp.float32)

    out = model_forward(x, w.T, gamma, beta, noise)
    jax.block_until_ready(out)
    assert out.shape == (B, OUT) and out.dtype == jnp.float32
    assert bool(jnp.all(jnp.isfinite(out)))
    print("KERNEL_OK")
</pallas_src>

<mosaic_0001>
module attributes {stable_mosaic.version = 11 : i64} {
  func.func @_fused_kernel(%arg0: i32, %arg1: memref<8x10xf32, #tpu.memory_space<vmem>>, %arg2: memref<10x128xf32, #tpu.memory_space<vmem>>, %arg3: memref<1x128xf32, #tpu.memory_space<vmem>>, %arg4: memref<1x128xf32, #tpu.memory_space<vmem>>, %arg5: memref<8x128xf32, #tpu.memory_space<vmem>>, %arg6: memref<8x128xf32, #tpu.memory_space<vmem>>) attributes {dimension_semantics = [#tpu.dimension_semantics<parallel>], iteration_bounds = array<i64: 1>, scalar_prefetch = 0 : i64, scratch_operands = 0 : i64, tpu.core_type = #tpu.core_type<tc>, window_params = [{pipeline_mode = #tpu.pipeline_mode<synchronous>, transform_indices = @transform_0, window_bounds = array<i64: 8, 10>}, {transform_indices = @transform_1, window_bounds = array<i64: 10, 128>}, {transform_indices = @transform_2, window_bounds = array<i64: 1, 128>}, {transform_indices = @transform_3, window_bounds = array<i64: 1, 128>}, {transform_indices = @transform_4, window_bounds = array<i64: 8, 128>}, {transform_indices = @transform_5, window_bounds = array<i64: 8, 128>}]} {
    %c0 = arith.constant 0 : index
    %c0_0 = arith.constant 0 : index
    %0 = vector.load %arg1[%c0, %c0_0] : memref<8x10xf32, #tpu.memory_space<vmem>>, vector<8x10xf32>
    %1 = arith.truncf %0 : vector<8x10xf32> to vector<8x10xbf16>
    %c0_1 = arith.constant 0 : index
    %c0_2 = arith.constant 0 : index
    %2 = vector.load %arg2[%c0_1, %c0_2] : memref<10x128xf32, #tpu.memory_space<vmem>>, vector<10x128xf32>
    %3 = arith.truncf %2 : vector<10x128xf32> to vector<10x128xbf16>
    %cst = arith.constant dense<0.000000e+00> : vector<8x128xf32>
    %4 = tpu.matmul %1, %3, %cst {dimension_numbers = #tpu.dot_dimension_numbers<[1], [0], [0], [1], [0, 0, 1, 1], [], []>} : vector<8x10xbf16>, vector<10x128xbf16>, vector<8x128xf32> -> vector<8x128xf32>
    %cst_3 = arith.constant dense<0.000000e+00> : vector<128xf32>
    %5 = vector.multi_reduction <add>, %4, %cst_3 [0] : vector<8x128xf32> to vector<128xf32>
    %6 = vector.shape_cast %5 : vector<128xf32> to vector<1x128xf32>
    %cst_4 = arith.constant 8.000000e+00 : f32
    %7 = vector.broadcast %cst_4 : f32 to vector<1x128xf32>
    %8 = arith.divf %6, %7 : vector<1x128xf32>
    %9 = arith.mulf %4, %4 : vector<8x128xf32>
    %cst_5 = arith.constant dense<0.000000e+00> : vector<128xf32>
    %10 = vector.multi_reduction <add>, %9, %cst_5 [0] : vector<8x128xf32> to vector<128xf32>
    %11 = vector.shape_cast %10 : vector<128xf32> to vector<1x128xf32>
    %cst_6 = arith.constant 8.000000e+00 : f32
    %12 = vector.broadcast %cst_6 : f32 to vector<1x128xf32>
    %13 = arith.divf %11, %12 : vector<1x128xf32>
    %14 = arith.mulf %8, %8 : vector<1x128xf32>
    %15 = arith.subf %13, %14 : vector<1x128xf32>
    %c0_7 = arith.constant 0 : index
    %c0_8 = arith.constant 0 : index
    %16 = vector.load %arg3[%c0_7, %c0_8] : memref<1x128xf32, #tpu.memory_space<vmem>>, vector<1x128xf32>
    %cst_9 = arith.constant 9.99999974E-6 : f32
    %17 = vector.broadcast %cst_9 : f32 to vector<1x128xf32>
    %18 = arith.addf %15, %17 : vector<1x128xf32>
    %19 = math.rsqrt %18 : vector<1x128xf32>
    %20 = arith.mulf %16, %19 : vector<1x128xf32>
    %c0_10 = arith.constant 0 : index
    %c0_11 = arith.constant 0 : index
    %21 = vector.load %arg4[%c0_10, %c0_11] : memref<1x128xf32, #tpu.memory_space<vmem>>, vector<1x128xf32>
    %22 = arith.mulf %8, %20 : vector<1x128xf32>
    %23 = arith.subf %21, %22 : vector<1x128xf32>
    %24 = vector.broadcast %20 : vector<1x128xf32> to vector<8x128xf32>
    %25 = arith.mulf %4, %24 : vector<8x128xf32>
    %26 = vector.broadcast %23 : vector<1x128xf32> to vector<8x128xf32>
    %27 = arith.addf %25, %26 : vector<8x128xf32>
    %c0_12 = arith.constant 0 : index
    %c0_13 = arith.constant 0 : index
    %28 = vector.load %arg5[%c0_12, %c0_13] : memref<8x128xf32, #tpu.memory_space<vmem>>, vector<8x128xf32>
    %29 = arith.addf %27, %28 : vector<8x128xf32>
    %c0_14 = arith.constant 0 : index
    %c0_15 = arith.constant 0 : index
    %30 = vector.load %arg6[%c0_14, %c0_15] : memref<8x128xf32, #tpu.memory_space<vmem>>, vector<8x128xf32>
    tpu.vector_store %arg6[%c0_14, %c0_15], %29 {strides = array<i32>} : memref<8x128xf32, #tpu.memory_space<vmem>>, vector<8x128xf32>,
    return
  }
  func.func @transform_0(%arg0: i32) -> (i32, i32) {
    %c0_i32 = arith.constant 0 : i32
    %c0_i32_0 = arith.constant 0 : i32
    %c0_i32_1 = arith.constant 0 : i32
    return %c0_i32, %c0_i32_0 : i32, i32
  }
  func.func @transform_1(%arg0: i32) -> (i32, i32) {
    %c0_i32 = arith.constant 0 : i32
    %c0_i32_0 = arith.constant 0 : i32
    return %c0_i32, %arg0 : i32, i32
  }
  func.func @transform_2(%arg0: i32) -> (i32, i32) {
    %c0_i32 = arith.constant 0 : i32
    %c0_i32_0 = arith.constant 0 : i32
    return %c0_i32, %arg0 : i32, i32
  }
  func.func @transform_3(%arg0: i32) -> (i32, i32) {
    %c0_i32 = arith.constant 0 : i32
    %c0_i32_0 = arith.constant 0 : i32
    return %c0_i32, %arg0 : i32, i32
  }
  func.func @transform_4(%arg0: i32) -> (i32, i32) {
    %c0_i32 = arith.constant 0 : i32
    %c0_i32_0 = arith.constant 0 : i32
    return %c0_i32, %arg0 : i32, i32
  }
  func.func @transform_5(%arg0: i32) -> (i32, i32) {
    %c0_i32 = arith.constant 0 : i32
    %c0_i32_0 = arith.constant 0 : i32
    return %c0_i32, %arg0 : i32, i32
  }
}

</mosaic_0001>

<bundles_post_ra>
// kernel: tpu_custom_call.1
= control target key start
LH: loop header
LB: loop body
LE: loop exit
PB: predicated region body
PF: predicated region fallthrough
CT: control target
= control target key end

     0   :  { %10 = vsyncpa [#allocation3], 0  ;;  %s329_s0 = inlined_call_operand.hbm [shape: f32[8,10], index: 0, kind: input, shape index: {}]   ;;  %s330_s1 = inlined_call_operand.hbm [shape: f32[10,128], index: 1, kind: input, shape index: {}]   ;;  %s331_s2 = inlined_call_operand.vmem [shape: f32[1,128], index: 2, kind: input, shape index: {}]   ;;  %s332_s3 = inlined_call_operand.vmem [shape: f32[1,128], index: 3, kind: input, shape index: {}]   ;;  %s333_s4 = inlined_call_operand.hbm [shape: f32[8,128], index: 4, kind: input, shape index: {}]   ;;  %s334_s5 = inlined_call_operand.hbm [shape: f32[8,128], index: 5, kind: output, shape index: {}]  }
   0x1   :  { %11 = vsyncpa [#allocation6], 0  ;;  %s28_s20 = sshll.u32 %s330_s1, 4  ;;  %s29_s20 = int_to_ptr.hbm [resolvable:$true] %s28_s20 }
   0x2   :  { %12 = vsyncpa [#allocation4], 0  ;;  %s274_s21 = smov [#allocation5]   ;;  %s18_s25 = sshll.u32 %s329_s0, 4  ;;  %s19_s25 = int_to_ptr.hbm [resolvable:$true] %s18_s25 }
   0x3   :  { %s30_s22 = sshll.u32 %s274_s21, 4  ;;  %s275_s26 = smov 128   ;;  %s31_s22 = int_to_ptr.vmem [resolvable:$true] %s30_s22 }
   0x4   :  { %s276_s27 = smov 8   ;;  %s277_s28 = smov [#allocation2]  }
   0x5   :  { %36 = dma.hbm_to_vmem [thread:$0]  %s29_s20, 256, %s31_s22, [#allocation6], %s275_s26, %s275_s26, %s276_s27  }
   0x6   :  { %s20_s29 = sshll.u32 %s277_s28, 4  ;;  %s46_s7 = sshll.u32 %s333_s4, 4  ;;  %s21_s29 = int_to_ptr.vmem [resolvable:$true] %s20_s29  ;;  %s47_s7 = int_to_ptr.hbm [resolvable:$true] %s46_s7 }
   0x7   :  { %23 = dma.hbm_to_vmem [thread:$0]  %s19_s25, 128, %s21_s29, [#allocation3]  }
   0x8   :  { %s278_s1 = smov [#allocation7]  }
   0x9   :  { %s48_s8 = sshll.u32 %s278_s1, 4  ;;  %s49_s8 = int_to_ptr.vmem [resolvable:$true] %s48_s8 }
   0xa   :  { %51 = dma.hbm_to_vmem [thread:$0]  %s47_s7, 128, %s49_s8, [#allocation6]  }
   0xb   :  { %268 = dma.done.wait [#allocation3], 128  }
   0xc   :  { %269 = vsyncadd [#allocation3], 4294967168 }
   0xd   :  { %270 = dma.done.wait [#allocation6], 384  }
   0xe   :  { %271 = vsyncadd [#allocation6], 4294966912  ;;  %v67_v0 = vld [vmem:[#allocation5] sm:$0xff]  ;;  %v68_v1 = vld [vmem:[#allocation5 + $0x8] sm:$0x3]  ;;  %vm74_vm0 = vcmask 1044480  }
   0xf   :  { %v65_v2 = vld [vmem:[#allocation2] sm:$0xff]  ;;  %v69_v3 = vpack.c.bf16 %v68_v1, %v67_v0  ;;  %vm70_vm1 = vcmask 80896   ;;  %v279_v6 = vmov 8.0   ;;  %v139_v48 = vld [vmem:[#allocation7] sm:$0xff]  ;;  %s280_s11 = smov [#allocation8]  }
  0x10   :  { %v66_v5 = vpack.c.bf16 %v65_v2, %v65_v2  ;;  %168 = vrcp.f32 %v279_v6  ;;  %v115_v38 = vld [vmem:[%s331_s2] sm:$0x1]  ;;  %s147_s12 = sshll.u32 %s280_s11, 4  ;;  %s149_s2 = sshll.u32 %s334_s5, 4  ;;  %s148_s12 = int_to_ptr.vmem [resolvable:$true] %s147_s12  ;;  %s150_s2 = int_to_ptr.hbm [resolvable:$true] %s149_s2 }
  0x11   :  { %v76_v4 = vsel %vm74_vm0, %v69_v3, 0  ;;  %v128_v42 = vld [vmem:[%s332_s3] sm:$0x1] }
  0x12   :  { %85 = vmatpush.bf16.msra.mxu0 %v76_v4 }
  0x15   :  { %160 = vmatmul.msk.bf16.vlgmr.msra.gmra.mxu0 %vm70_vm1, %v66_v5 }
  0x16   :  { %v169_v7 = vpop.eup %168 }
  0x17   :  { %v98_v8 = vmul.f32 8.0, %v169_v7  ;;  %vm102_vm2 = vweird.f32 %v169_v7 }
  0x19   :  { %v99_v9 = vsub.f32 1.0, %v98_v8 }
  0x1b   :  { %v100_v13 = vmul.f32 %v169_v7, %v99_v9 }
  0x1d   :  { %v101_v18 = vadd.f32 %v169_v7, %v100_v13 }
  0x1f   :  { %v103_v24 = vsel %vm102_vm2, %v169_v7, %v101_v18 }
  0x92   :  { %v87_v10 = vpop.f32.mrf.mxu0 }
  0x93   :  { %v91_v11 = vrot.slane %v87_v10, 4  ;;  %v105_v12 = vmul.f32 %v87_v10, %v87_v10 }
  0x95   :  { %v92_v14 = vadd.f32 %v91_v11, %v87_v10  ;;  %v106_v15 = vrot.slane %v105_v12, 4 }
  0x97   :  { %v93_v16 = vrot.slane %v92_v14, 2  ;;  %v107_v17 = vadd.f32 %v106_v15, %v105_v12 }
  0x99   :  { %v94_v19 = vadd.f32 %v93_v16, %v92_v14  ;;  %v108_v20 = vrot.slane %v107_v17, 2 }
  0x9a   :  { %v89_v21 = vpop.f32.mrf.mxu0 }
  0x9b   :  { %v95_v22 = vrot.slane %v94_v19, 1  ;;  %v109_v23 = vadd.f32 %v108_v20, %v107_v17 }
  0x9d   :  { %v96_v25 = vadd.f32 %v95_v22, %v94_v19  ;;  %v110_v26 = vrot.slane %v109_v23, 1 }
  0x9f   :  { %v104_v27 = vmul.f32 %v103_v24, %v96_v25  ;;  %v111_v28 = vadd.f32 %v110_v26, %v109_v23 }
  0xa1   :  { %v112_v29 = vmul.f32 %v111_v28, %v103_v24  ;;  %v113_v30 = vmul.f32 %v104_v27, %v104_v27 }
  0xa3   :  { %v114_v31 = vsub.f32 %v112_v29, %v113_v30 }
  0xa5   :  { %v116_v32 = vadd.f32 1e-05, %v114_v31 }
  0xa7   :  { %170 = vrsqrt.f32 %v116_v32  ;;  %vm123_vm4 = vweird.f32 %v116_v32 }
  0xad   :  { %v171_v33 = vpop.eup %170 }
  0xae   :  { %v118_v34 = vmul.f32 %v171_v33, %v116_v32  ;;  %vm124_vm3 = vweird.f32 %v171_v33 }
  0xaf   :  { %vm125_vm5 = vmor %vm123_vm4, %vm124_vm3 }
  0xb0   :  { %v119_v35 = vmul.f32 %v171_v33, %v118_v34 }
  0xb2   :  { %v120_v36 = vmul.f32 0.5, %v119_v35 }
  0xb4   :  { %v121_v37 = vsub.f32 1.5, %v120_v36 }
  0xb6   :  { %v122_v39 = vmul.f32 %v171_v33, %v121_v37 }
  0xb8   :  { %v126_v40 = vsel %vm125_vm5, %v171_v33, %v122_v39 }
  0xb9   :  { %v127_v41 = vmul.f32 %v126_v40, %v115_v38 }
  0xbb   :  { %v129_v43 = vmul.f32 %v127_v41, %v104_v27  ;;  %v132_v44 = vperm.slane %v127_v41, 0 }
  0xbd   :  { %v130_v45 = vsub.f32 %v128_v42, %v129_v43  ;;  %v134_v46 = vmul.f32 %v132_v44, %v87_v10 }
  0xbf   :  { %v136_v47 = vperm.slane %v130_v45, 0 }
  0xc1   :  { %v138_v49 = vadd.f32 %v136_v47, %v134_v46 }
  0xc3   :  { %v140_v50 = vadd.f32 %v139_v48, %v138_v49 }
  0xc5   :  { %141 = vst [vmem:[#allocation8] sm:$0xff] %v140_v50 }
  0xc6   :  { %152 = dma.vmem_to_hbm [thread:$0]  %s148_s12, 128, %s150_s2, [#allocation4]  }
  0xc7   :  { %272 = dma.done.wait [#allocation4], 128  }
  0xc8   :  { %273 = vsyncadd [#allocation4], 4294967168 }
  0xc9   :  { %157 = vsyncpa [#allocation3], 1 }
  0xca   :  { %158 = vsyncpa [#allocation6], 1 }
  0xcb   :  { %159 = vsyncpa [#allocation4], 1 }

</bundles_post_ra>
